<compile_context>
chip_gen: v7x
topology: tpu7x:2x2x1
jax: 0.10.0
libtpu: 0.0.40
codegen_flags: <defaults>
</compile_context>

<pallas_src>
import functools
import math

import jax
import jax.numpy as jnp
from jax.scipy.linalg import expm
from jax.experimental import pallas as pl
from jax.experimental.pallas import tpu as pltpu


def _round_up(x, m):
    return ((x + m - 1) // m) * m


def _svd_fused_kernel(x_ref, b_ref, w1_ref, w2_ref, o_ref, *, compute_dtype):
    """Fused: (x + b) @ W1 -> relu -> @ W2 -> - b, f32 accumulation on the MXU."""
    x = x_ref[...].astype(jnp.float32)
    b = b_ref[...].astype(jnp.float32)              # (1, F) broadcast over rows
    h = x + b                                       # VPU, f32
    h = jnp.dot(h.astype(compute_dtype), w1_ref[...],
                preferred_element_type=jnp.float32)       # U S V
    h = jnp.maximum(h, 0.0)                         # relu, f32
    y = jnp.dot(h.astype(compute_dtype), w2_ref[...],
                preferred_element_type=jnp.float32)       # V^T S^-1 U^T
    o_ref[...] = (y - b).astype(o_ref.dtype)


def svd_linear_with_inverse(x, bias, w1, w2, *, block_rows=256,
                            compute_dtype=jnp.float32, lane_multiple=128):
    """y = relu((x + bias) @ w1) @ w2 - bias, fused in one Pallas kernel.

    Weights are stored (in_features, out_features) so the kernel computes x @ W
    (== PyTorch Linear's x @ W.T). The module's own bias add/sub implies
    in_features == out_features.
    """
    n, f = x.shape
    assert w1.shape == (f, f) and w2.shape == (f, f), \
        "module's bias add/sub requires in_features == out_features"
    assert bias.shape == (f,)

    # Lane-dense feature padding (multiple of 128).
    f_p = _round_up(f, lane_multiple)

    # Row tile: multiple of 8 sublanes, no bigger than the (8-padded) batch,
    # halved (down to 128) until the grid has >= 2 steps for v7x megacore.
    n8 = _round_up(n, 8)
    br = max(8, min(_round_up(block_rows, 8), n8))
    while br > 128 and (n8 + br - 1) // br < 2:
        br //= 2
    br = _round_up(br, 8)
    n_p = _round_up(n, br)
    grid = (n_p // br,)

    # Zero padding keeps the fused math exact on the real rows/columns: padded
    # feature columns stay identically zero through both matmuls and the bias
    # add/sub; padded batch rows are sliced off afterwards.
    x_p = jnp.pad(x, ((0, n_p - n), (0, f_p - f)))
    b_p = jnp.pad(bias, (0, f_p - f)).reshape(1, f_p).astype(jnp.float32)
    w1_p = jnp.pad(w1, ((0, f_p - f), (0, f_p - f))).astype(compute_dtype)
    w2_p = jnp.pad(w2, ((0, f_p - f), (0, f_p - f))).astype(compute_dtype)

    # Explicit VMEM budget from the actual footprint: resident weights + bias,
    # double-buffered x/out tiles, f32 intermediates, plus headroom.
    wbytes = jnp.dtype(compute_dtype).itemsize
    xbytes = jnp.dtype(x.dtype).itemsize
    footprint = (2 * f_p * f_p * wbytes             # W1, W2 (resident)
                 + 2 * f_p * 4                      # bias
                 + 2 * 2 * br * f_p * xbytes        # x / out double buffers
                 + 3 * br * f_p * 4)                # f32 intermediates
    vmem_limit = min(max(int(1.25 * footprint) + (2 << 20), 32 << 20), 128 << 20)

    kernel = functools.partial(_svd_fused_kernel, compute_dtype=compute_dtype)

    def build(single_buffer_consts):
        const_kw = ({"pipeline_mode": pl.Buffered(1)}
                    if single_buffer_consts else {})
        return pl.pallas_call(
            kernel,
            out_shape=jax.ShapeDtypeStruct((n_p, f_p), x.dtype),
            grid=grid,
            in_specs=[
                pl.BlockSpec((br, f_p), lambda i: (i, 0)),               # x tile
                pl.BlockSpec((1, f_p), lambda i: (0, 0), **const_kw),    # bias
                pl.BlockSpec((f_p, f_p), lambda i: (0, 0), **const_kw),  # W1
                pl.BlockSpec((f_p, f_p), lambda i: (0, 0), **const_kw),  # W2
            ],
            out_specs=pl.BlockSpec((br, f_p), lambda i: (i, 0)),
            compiler_params=pltpu.CompilerParams(
                dimension_semantics=("parallel",),
                vmem_limit_bytes=vmem_limit),
        )

    try:
        out_p = build(True)(x_p, b_p, w1_p, w2_p)
        jax.block_until_ready(out_p)
    except Exception:
        # pipeline_mode=Buffered(1) not supported by this jax build -> default
        # double buffering (costs one extra weight copy of VMEM, still correct).
        out_p = build(False)(x_p, b_p, w1_p, w2_p)

    return out_p[:n, :f]


def _rotation(angles, n):
    """Orthogonal matrix from n(n-1)/2 angles via expm of a skew-symmetric matrix."""
    rows, cols = jnp.triu_indices(n, k=1)
    a = jnp.zeros((n, n), jnp.float32).at[rows, cols].set(angles)
    a = a - a.T
    return expm(a)


if __name__ == "__main__":
    F = 32           # in_features == out_features (required by the module's bias math)
    N = 256          # batch (small; padded/tiled into 2 x 128-row MXU tiles)
    key = jax.random.PRNGKey(0)
    k_u, k_v, k_b, k_x = jax.random.split(key, 4)

    n_ang = F * (F - 1) // 2
    # reset_parameters(): uniform(-pi/2, pi/2) angles, S = 1.  The module zeroes
    # the bias; use a small nonzero bias here so the add/sub path is exercised.
    Uweight = jax.random.uniform(k_u, (n_ang,), jnp.float32, -math.pi / 2, math.pi / 2)
    Vweight = jax.random.uniform(k_v, (n_ang,), jnp.float32, -math.pi / 2, math.pi / 2)
    Sweight = jnp.ones((F,), jnp.float32)
    bias = 0.1 * jax.random.normal(k_b, (F,), jnp.float32)

    x = jax.random.normal(k_x, (N, F), jnp.float32)

    # Parameter glue (plain JAX, one-time): dense forward and inverse factors.
    U = _rotation(Uweight, F)
    V = _rotation(Vweight, F)
    W1 = U @ jnp.diag(Sweight) @ V                  # U S V
    # R(-p) = R(p).T for skew-symmetric generators -> inverse factors are transposes.
    W2 = V.T @ jnp.diag(1.0 / Sweight) @ U.T        # V^T S^-1 U^T

    # f32 MXU path (reference precision).
    out = svd_linear_with_inverse(x, bias, W1, W2, compute_dtype=jnp.float32)
    jax.block_until_ready(out)
    assert out.shape == (N, F) and out.dtype == jnp.float32

    # Plain-JAX reference at highest precision.
    h = jax.lax.dot(x + bias, W1, precision=jax.lax.Precision.HIGHEST)
    ref = jax.lax.dot(jnp.maximum(h, 0.0), W2,
                      precision=jax.lax.Precision.HIGHEST) - bias
    assert float(jnp.max(jnp.abs(out - ref))) < 5e-2

    # bf16-fed MXU path (v6e/v7x fast path; bf16 operands, f32 accumulation).
    out_bf16 = svd_linear_with_inverse(x, bias, W1, W2, compute_dtype=jnp.bfloat16)
    jax.block_until_ready(out_bf16)
    assert float(jnp.max(jnp.abs(out_bf16 - ref))) < 5e-1

    print("KERNEL_OK")
</pallas_src>

<mosaic_0001>
module attributes {stable_mosaic.version = 11 : i64} {
  func.func @_svd_fused_kernel(%arg0: i32, %arg1: memref<128x128xf32, #tpu.memory_space<vmem>>, %arg2: memref<1x128xf32, #tpu.memory_space<vmem>>, %arg3: memref<128x128xf32, #tpu.memory_space<vmem>>, %arg4: memref<128x128xf32, #tpu.memory_space<vmem>>, %arg5: memref<128x128xf32, #tpu.memory_space<vmem>>) attributes {dimension_semantics = [#tpu.dimension_semantics<parallel>], iteration_bounds = array<i64: 2>, scalar_prefetch = 0 : i64, scratch_operands = 0 : i64, tpu.core_type = #tpu.core_type<tc>, window_params = [{transform_indices = @transform_0, window_bounds = array<i64: 128, 128>}, {pipeline_mode = #tpu.pipeline_mode<synchronous>, transform_indices = @transform_1, window_bounds = array<i64: 1, 128>}, {pipeline_mode = #tpu.pipeline_mode<synchronous>, transform_indices = @transform_2, window_bounds = array<i64: 128, 128>}, {pipeline_mode = #tpu.pipeline_mode<synchronous>, transform_indices = @transform_3, window_bounds = array<i64: 128, 128>}, {transform_indices = @transform_4, window_bounds = array<i64: 128, 128>}]} {
    %c0 = arith.constant 0 : index
    %c0_0 = arith.constant 0 : index
    %0 = vector.load %arg1[%c0, %c0_0] : memref<128x128xf32, #tpu.memory_space<vmem>>, vector<128x128xf32>
    %c0_1 = arith.constant 0 : index
    %c0_2 = arith.constant 0 : index
    %1 = vector.load %arg2[%c0_1, %c0_2] : memref<1x128xf32, #tpu.memory_space<vmem>>, vector<1x128xf32>
    %2 = vector.broadcast %1 : vector<1x128xf32> to vector<128x128xf32>
    %3 = arith.addf %0, %2 : vector<128x128xf32>
    %c0_3 = arith.constant 0 : index
    %c0_4 = arith.constant 0 : index
    %4 = vector.load %arg3[%c0_3, %c0_4] : memref<128x128xf32, #tpu.memory_space<vmem>>, vector<128x128xf32>
    %cst = arith.constant dense<0.000000e+00> : vector<128x128xf32>
    %5 = tpu.matmul %3, %4, %cst {dimension_numbers = #tpu.dot_dimension_numbers<[1], [0], [0], [1], [0, 0, 1, 1], [], []>} : vector<128x128xf32>, vector<128x128xf32>, vector<128x128xf32> -> vector<128x128xf32>
    %cst_5 = arith.constant 0.000000e+00 : f32
    %6 = vector.broadcast %cst_5 : f32 to vector<128x128xf32>
    %7 = arith.maximumf %5, %6 : vector<128x128xf32>
    %c0_6 = arith.constant 0 : index
    %c0_7 = arith.constant 0 : index
    %8 = vector.load %arg4[%c0_6, %c0_7] : memref<128x128xf32, #tpu.memory_space<vmem>>, vector<128x128xf32>
    %cst_8 = arith.constant dense<0.000000e+00> : vector<128x128xf32>
    %9 = tpu.matmul %7, %8, %cst_8 {dimension_numbers = #tpu.dot_dimension_numbers<[1], [0], [0], [1], [0, 0, 1, 1], [], []>} : vector<128x128xf32>, vector<128x128xf32>, vector<128x128xf32> -> vector<128x128xf32>
    %10 = vector.broadcast %1 : vector<1x128xf32> to vector<128x128xf32>
    %11 = arith.subf %9, %10 : vector<128x128xf32>
    %c0_9 = arith.constant 0 : index
    %c0_10 = arith.constant 0 : index
    %12 = vector.load %arg5[%c0_9, %c0_10] : memref<128x128xf32, #tpu.memory_space<vmem>>, vector<128x128xf32>
    tpu.vector_store %arg5[%c0_9, %c0_10], %11 {strides = array<i32>} : memref<128x128xf32, #tpu.memory_space<vmem>>, vector<128x128xf32>,
    return
  }
  func.func @transform_0(%arg0: i32) -> (i32, i32) {
    %c0_i32 = arith.constant 0 : i32
    %c0_i32_0 = arith.constant 0 : i32
    return %arg0, %c0_i32 : i32, i32
  }
  func.func @transform_1(%arg0: i32) -> (i32, i32) {
    %c0_i32 = arith.constant 0 : i32
    %c0_i32_0 = arith.constant 0 : i32
    %c0_i32_1 = arith.constant 0 : i32
    return %c0_i32, %c0_i32_0 : i32, i32
  }
  func.func @transform_2(%arg0: i32) -> (i32, i32) {
    %c0_i32 = arith.constant 0 : i32
    %c0_i32_0 = arith.constant 0 : i32
    %c0_i32_1 = arith.constant 0 : i32
    return %c0_i32, %c0_i32_0 : i32, i32
  }
  func.func @transform_3(%arg0: i32) -> (i32, i32) {
    %c0_i32 = arith.constant 0 : i32
    %c0_i32_0 = arith.constant 0 : i32
    %c0_i32_1 = arith.constant 0 : i32
    return %c0_i32, %c0_i32_0 : i32, i32
  }
  func.func @transform_4(%arg0: i32) -> (i32, i32) {
    %c0_i32 = arith.constant 0 : i32
    %c0_i32_0 = arith.constant 0 : i32
    return %arg0, %c0_i32 : i32, i32
  }
}

module attributes {stable_mosaic.version = 11 : i64} {
  func.func @_svd_fused_kernel(%arg0: i32, %arg1: memref<128x128xf32, #tpu.memory_space<vmem>>, %arg2: memref<1x128xf32, #tpu.memory_space<vmem>>, %arg3: memref<128x128xf32, #tpu.memory_space<vmem>>, %arg4: memref<128x128xf32, #tpu.memory_space<vmem>>, %arg5: memref<128x128xf32, #tpu.memory_space<vmem>>) attributes {dimension_semantics = [#tpu.dimension_semantics<parallel>], iteration_bounds = array<i64: 2>, scalar_prefetch = 0 : i64, scratch_operands = 0 : i64, tpu.core_type = #tpu.core_type<tc>, window_params = [{transform_indices = @transform_0, window_bounds = array<i64: 128, 128>}, {pipeline_mode = #tpu.pipeline_mode<synchronous>, transform_indices = @transform_1, window_bounds = array<i64: 1, 128>}, {pipeline_mode = #tpu.pipeline_mode<synchronous>, transform_indices = @transform_2, window_bounds = array<i64: 128, 128>}, {pipeline_mode = #tpu.pipeline_mode<synchronous>, transform_indices = @transform_3, window_bounds = array<i64: 128, 128>}, {transform_indices = @transform_4, window_bounds = array<i64: 128, 128>}]} {
    %c0 = arith.constant 0 : index
    %c0_0 = arith.constant 0 : index
    %0 = vector.load %arg1[%c0, %c0_0] : memref<128x128xf32, #tpu.memory_space<vmem>>, vector<128x128xf32>
    %c0_1 = arith.constant 0 : index
    %c0_2 = arith.constant 0 : index
    %1 = vector.load %arg2[%c0_1, %c0_2] : memref<1x128xf32, #tpu.memory_space<vmem>>, vector<1x128xf32>
    %2 = vector.broadcast %1 : vector<1x128xf32> to vector<128x128xf32>
    %3 = arith.addf %0, %2 : vector<128x128xf32>
    %c0_3 = arith.constant 0 : index
    %c0_4 = arith.constant 0 : index
    %4 = vector.load %arg3[%c0_3, %c0_4] : memref<128x128xf32, #tpu.memory_space<vmem>>, vector<128x128xf32>
    %cst = arith.constant dense<0.000000e+00> : vector<128x128xf32>
    %5 = tpu.matmul %3, %4, %cst {dimension_numbers = #tpu.dot_dimension_numbers<[1], [0], [0], [1], [0, 0, 1, 1], [], []>} : vector<128x128xf32>, vector<128x128xf32>, vector<128x128xf32> -> vector<128x128xf32>
    %cst_5 = arith.constant 0.000000e+00 : f32
    %6 = vector.broadcast %cst_5 : f32 to vector<128x128xf32>
    %7 = arith.maximumf %5, %6 : vector<128x128xf32>
    %c0_6 = arith.constant 0 : index
    %c0_7 = arith.constant 0 : index
    %8 = vector.load %arg4[%c0_6, %c0_7] : memref<128x128xf32, #tpu.memory_space<vmem>>, vector<128x128xf32>
    %cst_8 = arith.constant dense<0.000000e+00> : vector<128x128xf32>
    %9 = tpu.matmul %7, %8, %cst_8 {dimension_numbers = #tpu.dot_dimension_numbers<[1], [0], [0], [1], [0, 0, 1, 1], [], []>} : vector<128x128xf32>, vector<128x128xf32>, vector<128x128xf32> -> vector<128x128xf32>
    %10 = vector.broadcast %1 : vector<1x128xf32> to vector<128x128xf32>
    %11 = arith.subf %9, %10 : vector<128x128xf32>
    %c0_9 = arith.constant 0 : index
    %c0_10 = arith.constant 0 : index
    %12 = vector.load %arg5[%c0_9, %c0_10] : memref<128x128xf32, #tpu.memory_space<vmem>>, vector<128x128xf32>
    tpu.vector_store %arg5[%c0_9, %c0_10], %11 {strides = array<i32>} : memref<128x128xf32, #tpu.memory_space<vmem>>, vector<128x128xf32>,
    return
  }
  func.func @transform_0(%arg0: i32) -> (i32, i32) {
    %c0_i32 = arith.constant 0 : i32
    %c0_i32_0 = arith.constant 0 : i32
    return %arg0, %c0_i32 : i32, i32
  }
  func.func @transform_1(%arg0: i32) -> (i32, i32) {
    %c0_i32 = arith.constant 0 : i32
    %c0_i32_0 = arith.constant 0 : i32
    %c0_i32_1 = arith.constant 0 : i32
    return %c0_i32, %c0_i32_0 : i32, i32
  }
  func.func @transform_2(%arg0: i32) -> (i32, i32) {
    %c0_i32 = arith.constant 0 : i32
    %c0_i32_0 = arith.constant 0 : i32
    %c0_i32_1 = arith.constant 0 : i32
    return %c0_i32, %c0_i32_0 : i32, i32
  }
  func.func @transform_3(%arg0: i32) -> (i32, i32) {
    %c0_i32 = arith.constant 0 : i32
    %c0_i32_0 = arith.constant 0 : i32
    %c0_i32_1 = arith.constant 0 : i32
    return %c0_i32, %c0_i32_0 : i32, i32
  }
  func.func @transform_4(%arg0: i32) -> (i32, i32) {
    %c0_i32 = arith.constant 0 : i32
    %c0_i32_0 = arith.constant 0 : i32
    return %arg0, %c0_i32 : i32, i32
  }
}

</mosaic_0001>

<bundles_post_ra>
// kernel: tpu_custom_call.1
= control target key start
LH: loop header
LB: loop body
LE: loop exit
PB: predicated region body
PF: predicated region fallthrough
CT: control target
= control target key end

     0   :  { %9 = vsyncpa [#allocation3], 0  ;;  %s1606_s0 = inlined_call_operand.hbm [shape: f32[256,128], index: 0, kind: input, shape index: {}]   ;;  %s1607_s1 = inlined_call_operand.vmem [shape: f32[1,128], index: 1, kind: input, shape index: {}]   ;;  %s1608_s2 = inlined_call_operand.hbm [shape: f32[128,128], index: 2, kind: input, shape index: {}]   ;;  %s1609_s3 = inlined_call_operand.hbm [shape: f32[128,128], index: 3, kind: input, shape index: {}]   ;;  %s1610_s4 = inlined_call_operand.hbm [shape: f32[256,128], index: 4, kind: output, shape index: {}]  }
   0x1   :  { %11 = vsyncpa [#allocation3 + $0x1], 0 }
   0x2   :  { %12 = vsyncpa [#allocation6], 0 }
   0x3   :  { %13 = vsyncpa [#allocation4], 0 }
   0x4   :  { %15 = vsyncpa [#allocation4 + $0x1], 0  ;;  %s1285_s15 = smov 0   ;;  %s1287_s16 = smov 0  }
   0x5   :  { %s1289_s17 = smov 0   ;;  %s1291_s18 = smov 0  }
   0x6 LB: > { %s1306_s19 = sadd.s32 4294967295, %s1250_s18   ;;  %s762_s20 = sadd.s32 4294967294, %s1250_s18   ;;  %s1250_s18 = sphi %s1291_s18, %s1630_s18   ;;  %s1246_s17 = sphi %s1289_s17, %s1629_s17   ;;  %s1242_s16 = sphi %s1287_s16, %s1628_s16   ;;  %s1238_s15 = sphi %s1285_s15, %s1627_s15  }
   0x7   : > { %p41_p0 = scmp.ne.s32.totalorder %s1242_s16, %s1238_s15  ;;  %p1611_p1 = scmp.eq.s32.totalorder %s1306_s19, 0 }
   0x8   : > { %p134_p3 = scmp.eq.s32.totalorder %s762_s20, 1  ;;  %p763_p5 = scmp.ge.s32.totalorder %s1250_s18, 1 }
   0x9   : > { %p1315_p4 = por %p1611_p1, %p41_p0  ;;  %p141_p7 = scmp.lt.s32.totalorder %s1250_s18, 3 }
   0xa   : > { %p1320_p6 = por %p134_p3, %p41_p0  ;;  %s1252_s24 = smov [#allocation5]  }
   0xb   : > { %s1614_s21 = scalar_select %p1315_p4, 1, 0 }
   0xc   : > { %s1615_s22 = scalar_select %p1320_p6, 1, 0 }
   0xd   : > { %p1325_p8 = pnand %p763_p5, %p141_p7  ;;  %s156_s25 = sshll.u32 %s1252_s24, 4  ;;  %s1329_s25 = int_to_ptr.vmem [resolvable:$true] %s156_s25 }
   0xe   : > { %s1253_s27 = smov [#allocation7]   ;;  %s1094_s5 = scalar_lea.hbm %s1608_s2, 2048 }
   0xf   : > { %p1035_p9 = pneg %p1325_p8  ;;  %s169_s28 = sshll.u32 %s1253_s27, 4  ;;  %s1340_s28 = int_to_ptr.vmem [resolvable:$true] %s169_s28 }
  0x10   : > { %p1095_p12 = scmp.ne.s32.totalorder %s1608_s2, %s1094_s5  ;;  %p1101_p5 = scmp.lt.u32.totalorder %s1094_s5, %s1608_s2 }
  0x11   : > { %p1336_p11 = pnand %p1035_p9, %p1611_p1 }
  0x13   : > { %p1096_p13 = pneg %p1336_p11 }
  0x15   : > { %p1097_p0 = pnand %p1096_p13, %p1095_p12 }
  0x17   : > { %p1098_p3 = pneg %p1097_p0 }
  0x19   : > { %p1103_p7 = pnand %p1101_p5, %p1098_p3 }
  0x1b   : > { %1106 = shalt.err (!%p1103_p7)
}
  0x1c   : > { %s1107_s10 = scalar_lea.vmem %s1329_s25, 2048  ;;  %p1115_p2 = scmp.lt.s32.totalorder %s1329_s25, %s1329_s25 }
  0x1d   : > { %p1108_p9 = scmp.ne.s32.totalorder %s1329_s25, %s1107_s10  ;;  %p1116_p12 = scmp.lt.s32.totalorder %s1107_s10, %s1107_s10 }
  0x1f   : > { %p1110_p10 = pnand %p1108_p9, %p1096_p13  ;;  %p1117_p0 = por %p1116_p12, %p1115_p2 }
  0x21   : > { %p1111_p1 = pneg %p1110_p10 }
  0x23   : > { %p1118_p6 = pnand %p1117_p0, %p1111_p1 }
  0x25   : > { %1121 = shalt.err (!%p1118_p6)
}
  0x26   : > { %s1254_s11 = smov 128   ;;  %s1255_s12 = smov 8  }
  0x27   : > { %1038 = dma.hbm_to_vmem [thread:$0]  (!%p1336_p11), %s1608_s2, 2048, %s1329_s25, [#allocation6], %s1254_s11, %s1254_s11, %s1255_s12  }
  0x28   : > { %s1122_s27 = scalar_lea.hbm %s1609_s3, 2048 }
  0x29   : > { %p1123_p1 = scmp.ne.s32.totalorder %s1609_s3, %s1122_s27  ;;  %p1129_p10 = scmp.lt.u32.totalorder %s1122_s27, %s1609_s3 }
  0x2b   : > { %p1125_p2 = pnand %p1123_p1, %p1096_p13 }
  0x2d   : > { %p1126_p6 = pneg %p1125_p2 }
  0x2f   : > { %p1131_p3 = pnand %p1129_p10, %p1126_p6 }
  0x31   : > { %1134 = shalt.err (!%p1131_p3)
}
  0x32   : > { %s1135_s25 = scalar_lea.vmem %s1340_s28, 2048  ;;  %p1143_p12 = scmp.lt.s32.totalorder %s1340_s28, %s1340_s28 }
  0x33   : > { %p1136_p5 = scmp.ne.s32.totalorder %s1340_s28, %s1135_s25  ;;  %p1144_p0 = scmp.lt.s32.totalorder %s1135_s25, %s1135_s25 }
  0x35   : > { %p1138_p7 = pnand %p1136_p5, %p1096_p13  ;;  %p1145_p1 = por %p1144_p0, %p1143_p12 }
  0x37   : > { %p1139_p9 = pneg %p1138_p7 }
  0x39   : > { %p1146_p2 = pnand %p1145_p1, %p1139_p9 }
  0x3b   : > { %1149 = shalt.err (!%p1146_p2)
}
  0x3c   : > { %1041 = dma.hbm_to_vmem [thread:$0]  (!%p1336_p11), %s1609_s3, 2048, %s1340_s28, [#allocation6], %s1254_s11, %s1254_s11, %s1255_s12  }
  0x3d   : > { %s1401_s26 = sadd.s32 1, %s1250_s18   ;;  %s28_s9 = sadd.s32 1, %s1246_s17 }
  0x3e   : > { %s25_s10 = ssub.s32 %s1250_s18, %s1401_s26  ;;  %p35_p13 = scmp.ne.s32.totalorder %s1246_s17, %s1242_s16 }
  0x3f   : > { %p26_p6 = scmp.eq.s32.totalorder %s25_s10, 0  ;;  %p36_p10 = scmp.eq.s32.totalorder %s1250_s18, 0 }
  0x40   : > { %p1618_p3 = scmp.eq.s32.totalorder %s1306_s19, 1  ;;  %p1052_p7 = scmp.lt.s32.totalorder %s1250_s18, 2 }
  0x41   : > { %s1417_s14 = scalar_select %p26_p6, %s1246_s17, %s28_s9  }
  0x42   : > { %p1411_p5 = por %p1618_p3, %p35_p13  ;;  %p37_p9 = por %p36_p10, %p35_p13 }
  0x43   : > { %s183_s20 = sand.u32 1, %s1246_s17   ;;  %s781_s28 = sshll.u32 %s1250_s18, 11 }
  0x44   : > { %s1619_s13 = scalar_select %p1411_p5, 1, 0 }
  0x45   : > { %s767_s24 = sshll.u32 %s183_s20, 7  ;;  %s1424_s30 = scalar_lea.hbm %s1606_s0, %s781_s28 }
  0x46   : > { %s187_s5 = scalar_lea.vmem [#allocation2], %s767_s24  ;;  %p1428_p11 = pnand %p1052_p7, %p37_p9 }
  0x47   : > { %s194_s6 = sshll.u32 %s187_s5, 4  ;;  %s1432_s7 = scalar_lea.sflag [#allocation3], %s183_s20  ;;  %s1426_s6 = int_to_ptr.vmem [resolvable:$true] %s194_s6 }
  0x48   : > { %s1150_s8 = scalar_lea.hbm %s1424_s30, 2048  ;;  %p1152_p0 = pneg %p1428_p11 }
  0x49   : > { %p1151_p12 = scmp.ne.s32.totalorder %s1424_s30, %s1150_s8  ;;  %s1155_s24 = scalar_lea.hbm %s1606_s0, 4096 }
  0x4a   : > { %p1156_p13 = scmp.lt.u32.totalorder %s1424_s30, %s1606_s0  ;;  %p1157_p6 = scmp.lt.u32.totalorder %s1155_s24, %s1150_s8 }
  0x4b   : > { %p1153_p1 = pnand %p1152_p0, %p1151_p12  ;;  %p1159_p3 = scmp.lt.u32.totalorder %s1150_s8, %s1424_s30 }
  0x4c   : > { %p1158_p10 = por %p1157_p6, %p1156_p13 }
  0x4d   : > { %p1154_p2 = pneg %p1153_p1 }
  0x4e   : > { %p1160_p7 = por %p1159_p3, %p1158_p10 }
  0x50   : > { %p1161_p9 = pnand %p1160_p7, %p1154_p2 }
  0x52   : > { %1164 = shalt.err (!%p1161_p9)
}
  0x53   : > { %s1165_s20 = scalar_lea.vmem %s1426_s6, 2048  ;;  %s1256_s29 = smov [#allocation2]  }
  0x54   : > { %p1166_p12 = scmp.ne.s32.totalorder %s1426_s6, %s1165_s20  ;;  %s1170_s5 = sshll.u32 %s1256_s29, 4  ;;  %s1171_s5 = int_to_ptr.vmem [resolvable:$false] %s1170_s5 }
  0x55   : > { %s1172_s9 = scalar_lea.vmem %s1171_s5, 4096  ;;  %p1173_p4 = scmp.lt.s32.totalorder %s1426_s6, %s1171_s5 }
  0x56   : > { %p1168_p1 = pnand %p1166_p12, %p1152_p0  ;;  %p1174_p13 = scmp.lt.s32.totalorder %s1172_s9, %s1165_s20 }
  0x58   : > { %p1169_p5 = pneg %p1168_p1  ;;  %p1175_p6 = por %p1174_p13, %p1173_p4 }
  0x5a   : > { %p1176_p10 = pnand %p1175_p6, %p1169_p5 }
  0x5c   : > { %1179 = shalt.err (!%p1176_p10)
}
  0x5d   : > { %1045 = dma.hbm_to_vmem [thread:$0]  (!%p1428_p11), %s1424_s30, 2048, %s1426_s6, %s1432_s7, %s1254_s11, %s1254_s11, %s1255_s12  }
  0x5e   : > { %206 = sbr.rel (%p1325_p8) target bundleno = 614 (0x266), region = 36  ;;  %s1466_s8 = sand.u32 (!%p1325_p8), 1, %s1242_s16  }
  0x5f   : > { %s771_s10 = sshll.u32 (!%p1325_p8), %s1466_s8, 7  ;;  %s209_s24 = scalar_lea.sflag (!%p1325_p8), [#allocation3], %s1466_s8 }
  0x60   : > { %s1472_s25 = scalar_lea.vmem (!%p1325_p8), [#allocation2], %s771_s10  ;;  %p1621_p4 = scmp.ne.s32.totalorder (!%p1325_p8), %s1614_s21, 0 }
  0x65   : > { %1225 = dma.done.wait (%p1621_p4), %s209_s24, 2048  }
  0x66   : > { %1227 = vsyncadd (%p1621_p4), %s209_s24, 4294965248  ;;  %p1622_p5 = scmp.eq.s32.totalorder %s1306_s19, 0 }
  0x68   : > { %1229 = dma.done.wait (%p1622_p5), [#allocation6], 4096   ;;  %p1623_p8 = pmov %p1622_p5 }
  0x69   : > { %v286_v0 = vld [vmem:[#allocation5] sm:$0xff]  ;;  %v287_v1 = vld [vmem:[#allocation5 + $0x8] sm:$0xff]  ;;  %v288_v2 = vld [vmem:[#allocation5 + $0x10] sm:$0xff]  ;;  %s1523_s11 = scalar_lea.vmem [#allocation8], %s771_s10  ;;  %s782_s12 = sshll.u32 %s1306_s19, 11 }
  0x6a   : > { %1231 = vsyncadd (%p1623_p8), [#allocation6], 4294963200  ;;  %v959_v3 = vpack.c.bf16 %v287_v1, %v286_v0  ;;  %v289_v4 = vld [vmem:[#allocation5 + $0x18] sm:$0xff]  ;;  %v290_v6 = vld [vmem:[#allocation5 + $0x20] sm:$0xff]  ;;  %s670_s30 = sshll.u32 %s1523_s11, 4  ;;  %s1557_s28 = scalar_lea.hbm %s1610_s4, %s782_s12  ;;  %s1559_s30 = int_to_ptr.vmem [resolvable:$true] %s670_s30 }
  0x6b   : > { %v963_v5 = vpack.c.bf16 %v289_v4, %v288_v2  ;;  %v291_v7 = vld [vmem:[#allocation5 + $0x28] sm:$0xff]  ;;  %v247_v9 = vld [vmem:[%s1472_s25] sm:$0xff]  ;;  %v292_v11 = vld [vmem:[#allocation5 + $0x30] sm:$0xff]  ;;  %s657_s19 = scalar_lea.sflag [#allocation4], %s1466_s8  ;;  %s1180_s27 = scalar_lea.vmem %s1559_s30, 2048 }
  0x6c   : > { %960 = vmatprep.subr.bf16.mxu0 %v959_v3  ;;  %v967_v8 = vpack.c.bf16 %v291_v7, %v290_v6  ;;  %v1486_v10 = vld [vmem:[%s1607_s1] ss:$0 sm:$0xff]  ;;  %v293_v12 = vld [vmem:[#allocation5 + $0x38] sm:$0xff]  ;;  %v295_v16 = vld [vmem:[#allocation5 + $0x48] sm:$0xff]  ;;  %p1181_p11 = scmp.ne.s32.totalorder %s1559_s30, %s1180_s27  ;;  %p1624_p0 = scmp.ne.s32.totalorder %s1619_s13, 0 }
  0x6d   : > { %962 = vmatpush3.bf16.msra.mxu0 %v959_v3  ;;  %v270_v13 = vadd.f32 %v1486_v10, %v247_v9  ;;  %v971_v14 = vpack.c.bf16 %v293_v12, %v292_v11  ;;  %v294_v15 = vld [vmem:[#allocation5 + $0x40] sm:$0xff]  ;;  %v464_v18 = vld [vmem:[#allocation7 + $0x8] sm:$0xff]  ;;  %v465_v19 = vld [vmem:[#allocation7 + $0x10] sm:$0xff]  ;;  %s1257_s20 = smov [#allocation8]  }
  0x6e   : > { %964 = vmatprep.subr.bf16.mxu0 %v963_v5  ;;  %v463_v17 = vld [vmem:[#allocation7] sm:$0xff]  ;;  %v466_v21 = vld [vmem:[#allocation7 + $0x18] sm:$0xff]  ;;  %v975_v22 = vpack.c.bf16 %v295_v16, %v294_v15  ;;  %v468_v25 = vld [vmem:[#allocation7 + $0x28] sm:$0xff]  ;;  %p1182_p2 = pnand %p1181_p11, %p1624_p0  ;;  %s1184_s29 = sshll.u32 %s1257_s20, 4  ;;  %s1185_s29 = int_to_ptr.vmem [resolvable:$false] %s1184_s29 }
  0x6f   : > { %879 = vmatprep.mubr.f32.mxu0 %v270_v13  ;;  %v991_v20 = vpack.c.bf16 %v464_v18, %v463_v17  ;;  %v995_v23 = vpack.c.bf16 %v466_v21, %v465_v19  ;;  %v467_v24 = vld [vmem:[#allocation7 + $0x20] sm:$0xff]  ;;  %v296_v26 = vld [vmem:[#allocation5 + $0x50] sm:$0xff]  ;;  %v297_v27 = vld [vmem:[#allocation5 + $0x58] sm:$0xff]  ;;  %s1186_s5 = scalar_lea.vmem %s1185_s29, 4096  ;;  %p1187_p7 = scmp.lt.s32.totalorder %s1559_s30, %s1185_s29 }
  0x70   : > { %v999_v28 = vpack.c.bf16 %v468_v25, %v467_v24  ;;  %v979_v29 = vpack.c.bf16 %v297_v27, %v296_v26  ;;  %v469_v30 = vld [vmem:[#allocation7 + $0x30] sm:$0xff]  ;;  %v470_v31 = vld [vmem:[#allocation7 + $0x38] sm:$0xff]  ;;  %v298_v32 = vld [vmem:[#allocation5 + $0x60] sm:$0xff]  ;;  %p1183_p3 = pneg %p1182_p2  ;;  %p1188_p9 = scmp.lt.s32.totalorder %s1186_s5, %s1180_s27 }
  0x71   : > { %966 = vmatpush3.bf16.msra.mxu0 %v963_v5  ;;  %992 = vmatprep.subr.bf16.mxu1 %v991_v20  ;;  %v299_v33 = vld [vmem:[#allocation5 + $0x68] sm:$0xff]  ;;  %v1003_v34 = vpack.c.bf16 %v470_v31, %v469_v30  ;;  %v471_v36 = vld [vmem:[#allocation7 + $0x40] sm:$0xff]  ;;  %v300_v38 = vld [vmem:[#allocation5 + $0x70] sm:$0xff] }
  0x72   : > { %968 = vmatprep.subr.bf16.mxu0 %v967_v8  ;;  %994 = vmatpush3.bf16.msra.mxu1 %v991_v20  ;;  %v983_v35 = vpack.c.bf16 %v299_v33, %v298_v32  ;;  %v472_v37 = vld [vmem:[#allocation7 + $0x48] sm:$0xff]  ;;  %v301_v39 = vld [vmem:[#allocation5 + $0x78] sm:$0xff]  ;;  %v473_v42 = vld [vmem:[#allocation7 + $0x50] sm:$0xff]  ;;  %p1189_p12 = por %p1188_p9, %p1187_p7 }
  0x73   : > { %996 = vmatprep.subr.bf16.mxu1 %v995_v23  ;;  %v1007_v40 = vpack.c.bf16 %v472_v37, %v471_v36  ;;  %v987_v41 = vpack.c.bf16 %v301_v39, %v300_v38  ;;  %v474_v43 = vld [vmem:[#allocation7 + $0x58] sm:$0xff]  ;;  %v248_v44 = vld [vmem:[%s1472_s25 + $0x8] sm:$0xff]  ;;  %v249_v46 = vld [vmem:[%s1472_s25 + $0x10] sm:$0xff] }
  0x74   : > { %v1011_v45 = vpack.c.bf16 %v474_v43, %v473_v42  ;;  %v475_v47 = vld [vmem:[#allocation7 + $0x60] sm:$0xff]  ;;  %v476_v48 = vld [vmem:[#allocation7 + $0x68] sm:$0xff]  ;;  %v271_v49 = vadd.f32 %v1486_v10, %v248_v44  ;;  %v272_v50 = vadd.f32 %v1486_v10, %v249_v46  ;;  %v250_v51 = vld [vmem:[%s1472_s25 + $0x18] sm:$0xff]  ;;  %p1190_p1 = pnand %p1189_p12, %p1183_p3 }
  0x75   : > { %970 = vmatpush3.bf16.msra.mxu0 %v967_v8  ;;  %v1015_v52 = vpack.c.bf16 %v476_v48, %v475_v47  ;;  %v251_v53 = vld [vmem:[%s1472_s25 + $0x20] sm:$0xff]  ;;  %v273_v54 = vadd.f32 %v1486_v10, %v250_v51  ;;  %v252_v56 = vld [vmem:[%s1472_s25 + $0x28] sm:$0xff]  ;;  %v253_v57 = vld [vmem:[%s1472_s25 + $0x30] sm:$0xff] }
  0x76   : > { %972 = vmatprep.subr.bf16.mxu0 %v971_v14  ;;  %998 = vmatpush3.bf16.msra.mxu1 %v995_v23  ;;  %v274_v55 = vadd.f32 %v1486_v10, %v251_v53  ;;  %v275_v58 = vadd.f32 %v1486_v10, %v252_v56  ;;  %v276_v59 = vadd.f32 %v1486_v10, %v253_v57  ;;  %v254_v60 = vld [vmem:[%s1472_s25 + $0x38] sm:$0xff]  ;;  %v255_v61 = vld [vmem:[%s1472_s25 + $0x40] sm:$0xff]  ;;  %v256_v0 = vld [vmem:[%s1472_s25 + $0x48] sm:$0xff] }
  0x77   : > { %1000 = vmatprep.subr.bf16.mxu1 %v999_v28  ;;  %v277_v62 = vadd.f32 %v1486_v10, %v254_v60  ;;  %v278_v63 = vadd.f32 %v1486_v10, %v255_v61  ;;  %v257_v1 = vld [vmem:[%s1472_s25 + $0x50] sm:$0xff]  ;;  %v279_v2 = vadd.f32 %v1486_v10, %v256_v0  ;;  %v258_v4 = vld [vmem:[%s1472_s25 + $0x58] sm:$0xff]  ;;  %v259_v5 = vld [vmem:[%s1472_s25 + $0x60] sm:$0xff] }
  0x78   : > { %v280_v3 = vadd.f32 %v1486_v10, %v257_v1  ;;  %v281_v6 = vadd.f32 %v1486_v10, %v258_v4  ;;  %v282_v7 = vadd.f32 %v1486_v10, %v259_v5  ;;  %v260_v8 = vld [vmem:[%s1472_s25 + $0x68] sm:$0xff]  ;;  %v261_v9 = vld [vmem:[%s1472_s25 + $0x70] sm:$0xff]  ;;  %v262_v13 = vld [vmem:[%s1472_s25 + $0x78] sm:$0xff] }
  0x79   : > { %974 = vmatpush3.bf16.msra.mxu0 %v971_v14  ;;  %v283_v11 = vadd.f32 %v1486_v10, %v260_v8  ;;  %v284_v12 = vadd.f32 %v1486_v10, %v261_v9  ;;  %v285_v14 = vadd.f32 %v1486_v10, %v262_v13  ;;  %v477_v15 = vld [vmem:[#allocation7 + $0x70] sm:$0xff]  ;;  %v478_v16 = vld [vmem:[#allocation7 + $0x78] sm:$0xff] }
  0x7a   : > { %976 = vmatprep.subr.bf16.mxu0 %v975_v22  ;;  %1002 = vmatpush3.bf16.msra.mxu1 %v999_v28  ;;  %v1019_v17 = vpack.c.bf16 %v478_v16, %v477_v15 }
  0x7b   : > { %1004 = vmatprep.subr.bf16.mxu1 %v1003_v34 }
  0x7d   : > { %978 = vmatpush3.bf16.msra.mxu0 %v975_v22 }
  0x7e   : > { %980 = vmatprep.subr.bf16.mxu0 %v979_v29  ;;  %1006 = vmatpush3.bf16.msra.mxu1 %v1003_v34 }
  0x7f   : > { %1008 = vmatprep.subr.bf16.mxu1 %v1007_v40 }
  0x81   : > { %982 = vmatpush3.bf16.msra.mxu0 %v979_v29 }
  0x82   : > { %984 = vmatprep.subr.bf16.mxu0 %v983_v35  ;;  %1010 = vmatpush3.bf16.msra.mxu1 %v1007_v40 }
  0x83   : > { %1012 = vmatprep.subr.bf16.mxu1 %v1011_v45 }
  0x85   : > { %986 = vmatpush3.bf16.msra.mxu0 %v983_v35 }
  0x86   : > { %988 = vmatprep.subr.bf16.mxu0 %v987_v41  ;;  %1014 = vmatpush3.bf16.msra.mxu1 %v1011_v45 }
  0x87   : > { %1016 = vmatprep.subr.bf16.mxu1 %v1015_v52 }
  0x89   : > { %990 = vmatpush3.bf16.msra.mxu0 %v987_v41 }
  0x8a   : > { %1018 = vmatpush3.bf16.msra.mxu1 %v1015_v52 }
  0x8b   : > { %1020 = vmatprep.subr.bf16.mxu1 %v1019_v17 }
  0x8c   : > { %880 = vmatmul.mubr.f32.vlgmr.msra.gmra.mrb[0].mxu0 %v271_v49 }
  0x8d   : > { %882 = vmatprep.mubr.f32.mxu0 %v272_v50 }
  0x8e   : > { %1022 = vmatpush3.bf16.msra.mxu1 %v1019_v17 }
  0x90   : > { %883 = vmatmul.mubr.f32.gmra.mrb[2].mxu0 %v273_v54 }
  0x91   : > { %885 = vmatprep.mubr.f32.mxu0 %v274_v55 }
  0x94   : > { %886 = vmatmul.mubr.f32.gmra.mrb[4].mxu0 %v275_v58 }
  0x95   : > { %888 = vmatprep.mubr.f32.mxu0 %v276_v59 }
  0x98   : > { %889 = vmatmul.mubr.f32.gmra.mrb[6].mxu0 %v277_v62 }
  0x99   : > { %891 = vmatprep.mubr.f32.mxu0 %v278_v63 }
  0x9c   : > { %892 = vmatmul.mubr.f32.gmra.mrb[8].mxu0 %v279_v2 }
  0x9d   : > { %894 = vmatprep.mubr.f32.mxu0 %v280_v3 }
  0xa0   : > { %895 = vmatmul.mubr.f32.gmra.mrb[10].mxu0 %v281_v6 }
  0xa1   : > { %897 = vmatprep.mubr.f32.mxu0 %v282_v7 }
  0xa4   : > { %898 = vmatmul.mubr.f32.gmra.mrb[12].mxu0 %v283_v11 }
  0xa5   : > { %900 = vmatprep.mubr.f32.mxu0 %v284_v12 }
  0xa8   : > { %901 = vmatmul.mubr.f32.gmra.mrb[14].mxu0 %v285_v14 }
 0x15f   : > { %v881_v18 = vpop.f32.mrb[0].mxu0 }
 0x160   : > { %v368_v19 = vpop.f32.mrb[1].mxu0  ;;  %v448_v21 = vmax.f32 %v881_v18, 0.0 }
 0x161   : > { %v447_v20 = vmax.f32 %v368_v19, 0.0 }
 0x163   : > { %v884_v22 = vpop.f32.mrb[2].mxu0  ;;  %935 = vmatprep.mubr.f32.mxu1 %v447_v20 }
 0x164   : > { %v378_v23 = vpop.f32.mrb[3].mxu0  ;;  %936 = vmatmul.mubr.f32.vlgmr.msra.gmra.mrb[0].mxu1 %v448_v21  ;;  %v450_v25 = vmax.f32 %v884_v22, 0.0 }
 0x165   : > { %v449_v24 = vmax.f32 %v378_v23, 0.0 }
 0x167   : > { %v887_v26 = vpop.f32.mrb[4].mxu0  ;;  %938 = vmatprep.mubr.f32.mxu1 %v449_v24 }
 0x168   : > { %v388_v27 = vpop.f32.mrb[5].mxu0  ;;  %939 = vmatmul.mubr.f32.gmra.mrb[2].mxu1 %v450_v25  ;;  %v452_v29 = vmax.f32 %v887_v26, 0.0 }
 0x169   : > { %v451_v28 = vmax.f32 %v388_v27, 0.0 }
 0x16b   : > { %v890_v30 = vpop.f32.mrb[6].mxu0  ;;  %941 = vmatprep.mubr.f32.mxu1 %v451_v28 }
 0x16c   : > { %v398_v31 = vpop.f32.mrb[7].mxu0  ;;  %942 = vmatmul.mubr.f32.gmra.mrb[4].mxu1 %v452_v29  ;;  %v454_v33 = vmax.f32 %v890_v30, 0.0 }
 0x16d   : > { %v453_v32 = vmax.f32 %v398_v31, 0.0 }
 0x16f   : > { %v893_v34 = vpop.f32.mrb[8].mxu0  ;;  %944 = vmatprep.mubr.f32.mxu1 %v453_v32 }
 0x170   : > { %v408_v35 = vpop.f32.mrb[9].mxu0  ;;  %945 = vmatmul.mubr.f32.gmra.mrb[6].mxu1 %v454_v33  ;;  %v456_v37 = vmax.f32 %v893_v34, 0.0 }
 0x171   : > { %v455_v36 = vmax.f32 %v408_v35, 0.0 }
 0x173   : > { %v896_v38 = vpop.f32.mrb[10].mxu0  ;;  %947 = vmatprep.mubr.f32.mxu1 %v455_v36 }
 0x174   : > { %v418_v39 = vpop.f32.mrb[11].mxu0  ;;  %948 = vmatmul.mubr.f32.gmra.mrb[8].mxu1 %v456_v37  ;;  %v458_v41 = vmax.f32 %v896_v38, 0.0 }
 0x175   : > { %v457_v40 = vmax.f32 %v418_v39, 0.0 }
 0x177   : > { %v899_v42 = vpop.f32.mrb[12].mxu0  ;;  %950 = vmatprep.mubr.f32.mxu1 %v457_v40 }
 0x178   : > { %v428_v43 = vpop.f32.mrb[13].mxu0  ;;  %951 = vmatmul.mubr.f32.gmra.mrb[10].mxu1 %v458_v41  ;;  %v460_v45 = vmax.f32 %v899_v42, 0.0 }
 0x179   : > { %v459_v44 = vmax.f32 %v428_v43, 0.0 }
 0x17b   : > { %v902_v46 = vpop.f32.mrb[14].mxu0  ;;  %953 = vmatprep.mubr.f32.mxu1 %v459_v44 }
 0x17c   : > { %v438_v47 = vpop.f32.mrb[15].mxu0  ;;  %954 = vmatmul.mubr.f32.gmra.mrb[12].mxu1 %v460_v45  ;;  %v462_v49 = vmax.f32 %v902_v46, 0.0 }
 0x17d   : > { %v461_v48 = vmax.f32 %v438_v47, 0.0 }
 0x17f   : > { %956 = vmatprep.mubr.f32.mxu1 %v461_v48 }
 0x180   : > { %957 = vmatmul.mubr.f32.gmra.mrb[14].mxu1 %v462_v49 }
 0x237   : > { %v937_v50 = vpop.f32.mrb[0].mxu1 }
 0x238   : > { %v625_v51 = vsub.f32 %v937_v50, %v1486_v10  ;;  %v545_v52 = vpop.f32.mrb[1].mxu1 }
 0x239   : > { %v624_v53 = vsub.f32 %v545_v52, %v1486_v10 }
 0x23a   : > { %641 = vst [vmem:[%s1523_s11 + $0x8] sm:$0xff] %v625_v51 }
 0x23b   : > { %640 = vst [vmem:[%s1523_s11] sm:$0xff] %v624_v53  ;;  %v940_v54 = vpop.f32.mrb[2].mxu1 }
 0x23c   : > { %v627_v55 = vsub.f32 %v940_v54, %v1486_v10  ;;  %v555_v56 = vpop.f32.mrb[3].mxu1 }
 0x23d   : > { %v626_v57 = vsub.f32 %v555_v56, %v1486_v10 }
 0x23e   : > { %643 = vst [vmem:[%s1523_s11 + $0x18] sm:$0xff] %v627_v55 }
 0x23f   : > { %642 = vst [vmem:[%s1523_s11 + $0x10] sm:$0xff] %v626_v57  ;;  %v943_v58 = vpop.f32.mrb[4].mxu1 }
 0x240   : > { %v629_v59 = vsub.f32 %v943_v58, %v1486_v10  ;;  %v565_v60 = vpop.f32.mrb[5].mxu1 }
 0x241   : > { %v628_v61 = vsub.f32 %v565_v60, %v1486_v10 }
 0x242   : > { %645 = vst [vmem:[%s1523_s11 + $0x28] sm:$0xff] %v629_v59 }
 0x243   : > { %644 = vst [vmem:[%s1523_s11 + $0x20] sm:$0xff] %v628_v61  ;;  %v946_v62 = vpop.f32.mrb[6].mxu1 }
 0x244   : > { %v631_v63 = vsub.f32 %v946_v62, %v1486_v10  ;;  %v575_v0 = vpop.f32.mrb[7].mxu1 }
 0x245   : > { %v630_v1 = vsub.f32 %v575_v0, %v1486_v10 }
 0x246   : > { %647 = vst [vmem:[%s1523_s11 + $0x38] sm:$0xff] %v631_v63 }
 0x247   : > { %646 = vst [vmem:[%s1523_s11 + $0x30] sm:$0xff] %v630_v1  ;;  %v949_v2 = vpop.f32.mrb[8].mxu1 }
 0x248   : > { %v633_v3 = vsub.f32 %v949_v2, %v1486_v10  ;;  %v585_v4 = vpop.f32.mrb[9].mxu1 }
 0x249   : > { %v632_v5 = vsub.f32 %v585_v4, %v1486_v10 }
 0x24a   : > { %649 = vst [vmem:[%s1523_s11 + $0x48] sm:$0xff] %v633_v3 }
 0x24b   : > { %648 = vst [vmem:[%s1523_s11 + $0x40] sm:$0xff] %v632_v5  ;;  %v952_v6 = vpop.f32.mrb[10].mxu1 }
 0x24c   : > { %v635_v7 = vsub.f32 %v952_v6, %v1486_v10  ;;  %v595_v8 = vpop.f32.mrb[11].mxu1 }
 0x24d   : > { %v634_v9 = vsub.f32 %v595_v8, %v1486_v10 }
 0x24e   : > { %651 = vst [vmem:[%s1523_s11 + $0x58] sm:$0xff] %v635_v7 }
 0x24f   : > { %650 = vst [vmem:[%s1523_s11 + $0x50] sm:$0xff] %v634_v9  ;;  %v955_v11 = vpop.f32.mrb[12].mxu1 }
 0x250   : > { %v637_v12 = vsub.f32 %v955_v11, %v1486_v10  ;;  %v605_v13 = vpop.f32.mrb[13].mxu1 }
 0x251   : > { %v636_v14 = vsub.f32 %v605_v13, %v1486_v10 }
 0x252   : > { %653 = vst [vmem:[%s1523_s11 + $0x68] sm:$0xff] %v637_v12 }
 0x253   : > { %652 = vst [vmem:[%s1523_s11 + $0x60] sm:$0xff] %v636_v14  ;;  %v958_v15 = vpop.f32.mrb[14].mxu1 }
 0x254   : > { %v639_v16 = vsub.f32 %v958_v15, %v1486_v10  ;;  %v615_v17 = vpop.f32.mrb[15].mxu1 }
 0x255   : > { %v638_v18 = vsub.f32 %v615_v17, %v1486_v10 }
 0x256   : > { %655 = vst [vmem:[%s1523_s11 + $0x78] sm:$0xff] %v639_v16 }
 0x257   : > { %654 = vst [vmem:[%s1523_s11 + $0x70] sm:$0xff] %v638_v18 }
 0x258   : > { %1193 = shalt.err (!%p1190_p1)
}
 0x259   : > { %s1194_s9 = scalar_lea.hbm %s1557_s28, 2048  ;;  %s1198_s25 = scalar_lea.hbm %s1610_s4, 4096 }
 0x25a   : > { %p1195_p13 = scmp.ne.s32.totalorder %s1557_s28, %s1194_s9  ;;  %p1199_p4 = scmp.lt.u32.totalorder %s1557_s28, %s1610_s4 }
 0x25b   : > { %p1200_p5 = scmp.lt.u32.totalorder %s1198_s25, %s1194_s9  ;;  %p1202_p11 = scmp.lt.u32.totalorder %s1194_s9, %s1557_s28 }
 0x25c   : > { %p1196_p6 = pnand %p1195_p13, %p1624_p0 }
 0x25d   : > { %p1201_p8 = por %p1200_p5, %p1199_p4 }
 0x25e   : > { %p1197_p10 = pneg %p1196_p6 }
 0x25f   : > { %p1203_p2 = por %p1202_p11, %p1201_p8 }
 0x261   : > { %p1204_p3 = pnand %p1203_p2, %p1197_p10 }
 0x263   : > { %1207 = shalt.err (!%p1204_p3)
}
 0x264   : > { %s1258_s11 = smov 128   ;;  %s1259_s12 = smov 8  }
 0x265   : > { %1033 = dma.vmem_to_hbm [thread:$0]  (%p1624_p0), %s1559_s30, 2048, %s1557_s28, %s657_s19, %s1258_s11, %s1258_s11, %s1259_s12  }
 0x266 PF: > { %s685_s6 = sand.u32 1, %s1238_s15   ;;  %p1625_p7 = scmp.ne.s32.totalorder %s1615_s22, 0 }
 0x267   : > { %p1626_p9 = scmp.ge.s32.totalorder %s1250_s18, 2  ;;  %s686_s7 = scalar_lea.sflag [#allocation4], %s685_s6 }
 0x269   : > { %p1047_p12 = pnand %p1626_p9, %p1625_p7 }
 0x26b   : > { %1233 = dma.done.wait (!%p1047_p12), %s686_s7, 2048  }
 0x26c   : > { %1235 = vsyncadd (!%p1047_p12), %s686_s7, 4294965248  ;;  %p18_p1 = scmp.ge.s32.totalorder %s1401_s26, 4   ;;  %s1627_s15 = smov %s1242_s16 }
 0x26d   : > { %s1628_s16 = smov %s1246_s17  ;;  %s1629_s17 = smov %s1417_s14 }
 0x26e   : > { %s1630_s18 = smov %s1401_s26  ;;  %20 = sbr.rel (!%p18_p1) target bundleno = 6 (0x6), region = 89 }
 0x275   :  { %691 = vsyncpa [#allocation3], 1 }
 0x276   :  { %693 = vsyncpa [#allocation3 + $0x1], 1 }
 0x277   :  { %694 = vsyncpa [#allocation6], 1 }
 0x278   :  { %695 = vsyncpa [#allocation4], 1 }
 0x279   :  { %697 = vsyncpa [#allocation4 + $0x1], 1 }

// kernel: tpu_custom_call.1
= control target key start
LH: loop header
LB: loop body
LE: loop exit
PB: predicated region body
PF: predicated region fallthrough
CT: control target
= control target key end

     0   :  { %9 = vsyncpa [#allocation3], 0  ;;  %s1606_s0 = inlined_call_operand.hbm [shape: f32[256,128], index: 0, kind: input, shape index: {}]   ;;  %s1607_s1 = inlined_call_operand.vmem [shape: f32[1,128], index: 1, kind: input, shape index: {}]   ;;  %s1608_s2 = inlined_call_operand.hbm [shape: f32[128,128], index: 2, kind: input, shape index: {}]   ;;  %s1609_s3 = inlined_call_operand.hbm [shape: f32[128,128], index: 3, kind: input, shape index: {}]   ;;  %s1610_s4 = inlined_call_operand.hbm [shape: f32[256,128], index: 4, kind: output, shape index: {}]  }
   0x1   :  { %11 = vsyncpa [#allocation3 + $0x1], 0 }
   0x2   :  { %12 = vsyncpa [#allocation6], 0 }
   0x3   :  { %13 = vsyncpa [#allocation4], 0 }
   0x4   :  { %15 = vsyncpa [#allocation4 + $0x1], 0  ;;  %s1285_s15 = smov 0   ;;  %s1287_s16 = smov 0  }
   0x5   :  { %s1289_s17 = smov 0   ;;  %s1291_s18 = smov 0  }
   0x6 LB: > { %s1306_s19 = sadd.s32 4294967295, %s1250_s18   ;;  %s762_s20 = sadd.s32 4294967294, %s1250_s18   ;;  %s1250_s18 = sphi %s1291_s18, %s1630_s18   ;;  %s1246_s17 = sphi %s1289_s17, %s1629_s17   ;;  %s1242_s16 = sphi %s1287_s16, %s1628_s16   ;;  %s1238_s15 = sphi %s1285_s15, %s1627_s15  }
   0x7   : > { %p41_p0 = scmp.ne.s32.totalorder %s1242_s16, %s1238_s15  ;;  %p1611_p1 = scmp.eq.s32.totalorder %s1306_s19, 0 }
   0x8   : > { %p134_p3 = scmp.eq.s32.totalorder %s762_s20, 1  ;;  %p763_p5 = scmp.ge.s32.totalorder %s1250_s18, 1 }
   0x9   : > { %p1315_p4 = por %p1611_p1, %p41_p0  ;;  %p141_p7 = scmp.lt.s32.totalorder %s1250_s18, 3 }
   0xa   : > { %p1320_p6 = por %p134_p3, %p41_p0  ;;  %s1252_s24 = smov [#allocation5]  }
   0xb   : > { %s1614_s21 = scalar_select %p1315_p4, 1, 0 }
   0xc   : > { %s1615_s22 = scalar_select %p1320_p6, 1, 0 }
   0xd   : > { %p1325_p8 = pnand %p763_p5, %p141_p7  ;;  %s156_s25 = sshll.u32 %s1252_s24, 4  ;;  %s1329_s25 = int_to_ptr.vmem [resolvable:$true] %s156_s25 }
   0xe   : > { %s1253_s27 = smov [#allocation7]   ;;  %s1094_s5 = scalar_lea.hbm %s1608_s2, 2048 }
   0xf   : > { %p1035_p9 = pneg %p1325_p8  ;;  %s169_s28 = sshll.u32 %s1253_s27, 4  ;;  %s1340_s28 = int_to_ptr.vmem [resolvable:$true] %s169_s28 }
  0x10   : > { %p1095_p12 = scmp.ne.s32.totalorder %s1608_s2, %s1094_s5  ;;  %p1101_p5 = scmp.lt.u32.totalorder %s1094_s5, %s1608_s2 }
  0x11   : > { %p1336_p11 = pnand %p1035_p9, %p1611_p1 }
  0x13   : > { %p1096_p13 = pneg %p1336_p11 }
  0x15   : > { %p1097_p0 = pnand %p1096_p13, %p1095_p12 }
  0x17   : > { %p1098_p3 = pneg %p1097_p0 }
  0x19   : > { %p1103_p7 = pnand %p1101_p5, %p1098_p3 }
  0x1b   : > { %1106 = shalt.err (!%p1103_p7)
}
  0x1c   : > { %s1107_s10 = scalar_lea.vmem %s1329_s25, 2048  ;;  %p1115_p2 = scmp.lt.s32.totalorder %s1329_s25, %s1329_s25 }
  0x1d   : > { %p1108_p9 = scmp.ne.s32.totalorder %s1329_s25, %s1107_s10  ;;  %p1116_p12 = scmp.lt.s32.totalorder %s1107_s10, %s1107_s10 }
  0x1f   : > { %p1110_p10 = pnand %p1108_p9, %p1096_p13  ;;  %p1117_p0 = por %p1116_p12, %p1115_p2 }
  0x21   : > { %p1111_p1 = pneg %p1110_p10 }
  0x23   : > { %p1118_p6 = pnand %p1117_p0, %p1111_p1 }
  0x25   : > { %1121 = shalt.err (!%p1118_p6)
}
  0x26   : > { %s1254_s11 = smov 128   ;;  %s1255_s12 = smov 8  }
  0x27   : > { %1038 = dma.hbm_to_vmem [thread:$0]  (!%p1336_p11), %s1608_s2, 2048, %s1329_s25, [#allocation6], %s1254_s11, %s1254_s11, %s1255_s12  }
  0x28   : > { %s1122_s27 = scalar_lea.hbm %s1609_s3, 2048 }
  0x29   : > { %p1123_p1 = scmp.ne.s32.totalorder %s1609_s3, %s1122_s27  ;;  %p1129_p10 = scmp.lt.u32.totalorder %s1122_s27, %s1609_s3 }
  0x2b   : > { %p1125_p2 = pnand %p1123_p1, %p1096_p13 }
  0x2d   : > { %p1126_p6 = pneg %p1125_p2 }
  0x2f   : > { %p1131_p3 = pnand %p1129_p10, %p1126_p6 }
  0x31   : > { %1134 = shalt.err (!%p1131_p3)
}
  0x32   : > { %s1135_s25 = scalar_lea.vmem %s1340_s28, 2048  ;;  %p1143_p12 = scmp.lt.s32.totalorder %s1340_s28, %s1340_s28 }
  0x33   : > { %p1136_p5 = scmp.ne.s32.totalorder %s1340_s28, %s1135_s25  ;;  %p1144_p0 = scmp.lt.s32.totalorder %s1135_s25, %s1135_s25 }
  0x35   : > { %p1138_p7 = pnand %p1136_p5, %p1096_p13  ;;  %p1145_p1 = por %p1144_p0, %p1143_p12 }
  0x37   : > { %p1139_p9 = pneg %p1138_p7 }
  0x39   : > { %p1146_p2 = pnand %p1145_p1, %p1139_p9 }
  0x3b   : > { %1149 = shalt.err (!%p1146_p2)
}
  0x3c   : > { %1041 = dma.hbm_to_vmem [thread:$0]  (!%p1336_p11), %s1609_s3, 2048, %s1340_s28, [#allocation6], %s1254_s11, %s1254_s11, %s1255_s12  }
  0x3d   : > { %s1401_s26 = sadd.s32 1, %s1250_s18   ;;  %s28_s9 = sadd.s32 1, %s1246_s17 }
  0x3e   : > { %s25_s10 = ssub.s32 %s1250_s18, %s1401_s26  ;;  %p35_p13 = scmp.ne.s32.totalorder %s1246_s17, %s1242_s16 }
  0x3f   : > { %p26_p6 = scmp.eq.s32.totalorder %s25_s10, 0  ;;  %p36_p10 = scmp.eq.s32.totalorder %s1250_s18, 0 }
  0x40   : > { %p1618_p3 = scmp.eq.s32.totalorder %s1306_s19, 1  ;;  %p1052_p7 = scmp.lt.s32.totalorder %s1250_s18, 2 }
  0x41   : > { %s1417_s14 = scalar_select %p26_p6, %s1246_s17, %s28_s9  }
  0x42   : > { %p1411_p5 = por %p1618_p3, %p35_p13  ;;  %p37_p9 = por %p36_p10, %p35_p13 }
  0x43   : > { %s183_s20 = sand.u32 1, %s1246_s17   ;;  %s781_s28 = sshll.u32 %s1250_s18, 11 }
  0x44   : > { %s1619_s13 = scalar_select %p1411_p5, 1, 0 }
  0x45   : > { %s767_s24 = sshll.u32 %s183_s20, 7  ;;  %s1424_s30 = scalar_lea.hbm %s1606_s0, %s781_s28 }
  0x46   : > { %s187_s5 = scalar_lea.vmem [#allocation2], %s767_s24  ;;  %p1428_p11 = pnand %p1052_p7, %p37_p9 }
  0x47   : > { %s194_s6 = sshll.u32 %s187_s5, 4  ;;  %s1432_s7 = scalar_lea.sflag [#allocation3], %s183_s20  ;;  %s1426_s6 = int_to_ptr.vmem [resolvable:$true] %s194_s6 }
  0x48   : > { %s1150_s8 = scalar_lea.hbm %s1424_s30, 2048  ;;  %p1152_p0 = pneg %p1428_p11 }
  0x49   : > { %p1151_p12 = scmp.ne.s32.totalorder %s1424_s30, %s1150_s8  ;;  %s1155_s24 = scalar_lea.hbm %s1606_s0, 4096 }
  0x4a   : > { %p1156_p13 = scmp.lt.u32.totalorder %s1424_s30, %s1606_s0  ;;  %p1157_p6 = scmp.lt.u32.totalorder %s1155_s24, %s1150_s8 }
  0x4b   : > { %p1153_p1 = pnand %p1152_p0, %p1151_p12  ;;  %p1159_p3 = scmp.lt.u32.totalorder %s1150_s8, %s1424_s30 }
  0x4c   : > { %p1158_p10 = por %p1157_p6, %p1156_p13 }
  0x4d   : > { %p1154_p2 = pneg %p1153_p1 }
  0x4e   : > { %p1160_p7 = por %p1159_p3, %p1158_p10 }
  0x50   : > { %p1161_p9 = pnand %p1160_p7, %p1154_p2 }
  0x52   : > { %1164 = shalt.err (!%p1161_p9)
}
  0x53   : > { %s1165_s20 = scalar_lea.vmem %s1426_s6, 2048  ;;  %s1256_s29 = smov [#allocation2]  }
  0x54   : > { %p1166_p12 = scmp.ne.s32.totalorder %s1426_s6, %s1165_s20  ;;  %s1170_s5 = sshll.u32 %s1256_s29, 4  ;;  %s1171_s5 = int_to_ptr.vmem [resolvable:$false] %s1170_s5 }
  0x55   : > { %s1172_s9 = scalar_lea.vmem %s1171_s5, 4096  ;;  %p1173_p4 = scmp.lt.s32.totalorder %s1426_s6, %s1171_s5 }
  0x56   : > { %p1168_p1 = pnand %p1166_p12, %p1152_p0  ;;  %p1174_p13 = scmp.lt.s32.totalorder %s1172_s9, %s1165_s20 }
  0x58   : > { %p1169_p5 = pneg %p1168_p1  ;;  %p1175_p6 = por %p1174_p13, %p1173_p4 }
  0x5a   : > { %p1176_p10 = pnand %p1175_p6, %p1169_p5 }
  0x5c   : > { %1179 = shalt.err (!%p1176_p10)
}
  0x5d   : > { %1045 = dma.hbm_to_vmem [thread:$0]  (!%p1428_p11), %s1424_s30, 2048, %s1426_s6, %s1432_s7, %s1254_s11, %s1254_s11, %s1255_s12  }
  0x5e   : > { %206 = sbr.rel (%p1325_p8) target bundleno = 614 (0x266), region = 36  ;;  %s1466_s8 = sand.u32 (!%p1325_p8), 1, %s1242_s16  }
  0x5f   : > { %s771_s10 = sshll.u32 (!%p1325_p8), %s1466_s8, 7  ;;  %s209_s24 = scalar_lea.sflag (!%p1325_p8), [#allocation3], %s1466_s8 }
  0x60   : > { %s1472_s25 = scalar_lea.vmem (!%p1325_p8), [#allocation2], %s771_s10  ;;  %p1621_p4 = scmp.ne.s32.totalorder (!%p1325_p8), %s1614_s21, 0 }
  0x65   : > { %1225 = dma.done.wait (%p1621_p4), %s209_s24, 2048  }
  0x66   : > { %1227 = vsyncadd (%p1621_p4), %s209_s24, 4294965248  ;;  %p1622_p5 = scmp.eq.s32.totalorder %s1306_s19, 0 }
  0x68   : > { %1229 = dma.done.wait (%p1622_p5), [#allocation6], 4096   ;;  %p1623_p8 = pmov %p1622_p5 }
  0x69   : > { %v286_v0 = vld [vmem:[#allocation5] sm:$0xff]  ;;  %v287_v1 = vld [vmem:[#allocation5 + $0x8] sm:$0xff]  ;;  %v288_v2 = vld [vmem:[#allocation5 + $0x10] sm:$0xff]  ;;  %s1523_s11 = scalar_lea.vmem [#allocation8], %s771_s10  ;;  %s782_s12 = sshll.u32 %s1306_s19, 11 }
  0x6a   : > { %1231 = vsyncadd (%p1623_p8), [#allocation6], 4294963200  ;;  %v959_v3 = vpack.c.bf16 %v287_v1, %v286_v0  ;;  %v289_v4 = vld [vmem:[#allocation5 + $0x18] sm:$0xff]  ;;  %v290_v6 = vld [vmem:[#allocation5 + $0x20] sm:$0xff]  ;;  %s670_s30 = sshll.u32 %s1523_s11, 4  ;;  %s1557_s28 = scalar_lea.hbm %s1610_s4, %s782_s12  ;;  %s1559_s30 = int_to_ptr.vmem [resolvable:$true] %s670_s30 }
  0x6b   : > { %v963_v5 = vpack.c.bf16 %v289_v4, %v288_v2  ;;  %v291_v7 = vld [vmem:[#allocation5 + $0x28] sm:$0xff]  ;;  %v247_v9 = vld [vmem:[%s1472_s25] sm:$0xff]  ;;  %v292_v11 = vld [vmem:[#allocation5 + $0x30] sm:$0xff]  ;;  %s657_s19 = scalar_lea.sflag [#allocation4], %s1466_s8  ;;  %s1180_s27 = scalar_lea.vmem %s1559_s30, 2048 }
  0x6c   : > { %960 = vmatprep.subr.bf16.mxu0 %v959_v3  ;;  %v967_v8 = vpack.c.bf16 %v291_v7, %v290_v6  ;;  %v1486_v10 = vld [vmem:[%s1607_s1] ss:$0 sm:$0xff]  ;;  %v293_v12 = vld [vmem:[#allocation5 + $0x38] sm:$0xff]  ;;  %v295_v16 = vld [vmem:[#allocation5 + $0x48] sm:$0xff]  ;;  %p1181_p11 = scmp.ne.s32.totalorder %s1559_s30, %s1180_s27  ;;  %p1624_p0 = scmp.ne.s32.totalorder %s1619_s13, 0 }
  0x6d   : > { %962 = vmatpush3.bf16.msra.mxu0 %v959_v3  ;;  %v270_v13 = vadd.f32 %v1486_v10, %v247_v9  ;;  %v971_v14 = vpack.c.bf16 %v293_v12, %v292_v11  ;;  %v294_v15 = vld [vmem:[#allocation5 + $0x40] sm:$0xff]  ;;  %v464_v18 = vld [vmem:[#allocation7 + $0x8] sm:$0xff]  ;;  %v465_v19 = vld [vmem:[#allocation7 + $0x10] sm:$0xff]  ;;  %s1257_s20 = smov [#allocation8]  }
  0x6e   : > { %964 = vmatprep.subr.bf16.mxu0 %v963_v5  ;;  %v463_v17 = vld [vmem:[#allocation7] sm:$0xff]  ;;  %v466_v21 = vld [vmem:[#allocation7 + $0x18] sm:$0xff]  ;;  %v975_v22 = vpack.c.bf16 %v295_v16, %v294_v15  ;;  %v468_v25 = vld [vmem:[#allocation7 + $0x28] sm:$0xff]  ;;  %p1182_p2 = pnand %p1181_p11, %p1624_p0  ;;  %s1184_s29 = sshll.u32 %s1257_s20, 4  ;;  %s1185_s29 = int_to_ptr.vmem [resolvable:$false] %s1184_s29 }
  0x6f   : > { %879 = vmatprep.mubr.f32.mxu0 %v270_v13  ;;  %v991_v20 = vpack.c.bf16 %v464_v18, %v463_v17  ;;  %v995_v23 = vpack.c.bf16 %v466_v21, %v465_v19  ;;  %v467_v24 = vld [vmem:[#allocation7 + $0x20] sm:$0xff]  ;;  %v296_v26 = vld [vmem:[#allocation5 + $0x50] sm:$0xff]  ;;  %v297_v27 = vld [vmem:[#allocation5 + $0x58] sm:$0xff]  ;;  %s1186_s5 = scalar_lea.vmem %s1185_s29, 4096  ;;  %p1187_p7 = scmp.lt.s32.totalorder %s1559_s30, %s1185_s29 }
  0x70   : > { %v999_v28 = vpack.c.bf16 %v468_v25, %v467_v24  ;;  %v979_v29 = vpack.c.bf16 %v297_v27, %v296_v26  ;;  %v469_v30 = vld [vmem:[#allocation7 + $0x30] sm:$0xff]  ;;  %v470_v31 = vld [vmem:[#allocation7 + $0x38] sm:$0xff]  ;;  %v298_v32 = vld [vmem:[#allocation5 + $0x60] sm:$0xff]  ;;  %p1183_p3 = pneg %p1182_p2  ;;  %p1188_p9 = scmp.lt.s32.totalorder %s1186_s5, %s1180_s27 }
  0x71   : > { %966 = vmatpush3.bf16.msra.mxu0 %v963_v5  ;;  %992 = vmatprep.subr.bf16.mxu1 %v991_v20  ;;  %v299_v33 = vld [vmem:[#allocation5 + $0x68] sm:$0xff]  ;;  %v1003_v34 = vpack.c.bf16 %v470_v31, %v469_v30  ;;  %v471_v36 = vld [vmem:[#allocation7 + $0x40] sm:$0xff]  ;;  %v300_v38 = vld [vmem:[#allocation5 + $0x70] sm:$0xff] }
  0x72   : > { %968 = vmatprep.subr.bf16.mxu0 %v967_v8  ;;  %994 = vmatpush3.bf16.msra.mxu1 %v991_v20  ;;  %v983_v35 = vpack.c.bf16 %v299_v33, %v298_v32  ;;  %v472_v37 = vld [vmem:[#allocation7 + $0x48] sm:$0xff]  ;;  %v301_v39 = vld [vmem:[#allocation5 + $0x78] sm:$0xff]  ;;  %v473_v42 = vld [vmem:[#allocation7 + $0x50] sm:$0xff]  ;;  %p1189_p12 = por %p1188_p9, %p1187_p7 }
  0x73   : > { %996 = vmatprep.subr.bf16.mxu1 %v995_v23  ;;  %v1007_v40 = vpack.c.bf16 %v472_v37, %v471_v36  ;;  %v987_v41 = vpack.c.bf16 %v301_v39, %v300_v38  ;;  %v474_v43 = vld [vmem:[#allocation7 + $0x58] sm:$0xff]  ;;  %v248_v44 = vld [vmem:[%s1472_s25 + $0x8] sm:$0xff]  ;;  %v249_v46 = vld [vmem:[%s1472_s25 + $0x10] sm:$0xff] }
  0x74   : > { %v1011_v45 = vpack.c.bf16 %v474_v43, %v473_v42  ;;  %v475_v47 = vld [vmem:[#allocation7 + $0x60] sm:$0xff]  ;;  %v476_v48 = vld [vmem:[#allocation7 + $0x68] sm:$0xff]  ;;  %v271_v49 = vadd.f32 %v1486_v10, %v248_v44  ;;  %v272_v50 = vadd.f32 %v1486_v10, %v249_v46  ;;  %v250_v51 = vld [vmem:[%s1472_s25 + $0x18] sm:$0xff]  ;;  %p1190_p1 = pnand %p1189_p12, %p1183_p3 }
  0x75   : > { %970 = vmatpush3.bf16.msra.mxu0 %v967_v8  ;;  %v1015_v52 = vpack.c.bf16 %v476_v48, %v475_v47  ;;  %v251_v53 = vld [vmem:[%s1472_s25 + $0x20] sm:$0xff]  ;;  %v273_v54 = vadd.f32 %v1486_v10, %v250_v51  ;;  %v252_v56 = vld [vmem:[%s1472_s25 + $0x28] sm:$0xff]  ;;  %v253_v57 = vld [vmem:[%s1472_s25 + $0x30] sm:$0xff] }
  0x76   : > { %972 = vmatprep.subr.bf16.mxu0 %v971_v14  ;;  %998 = vmatpush3.bf16.msra.mxu1 %v995_v23  ;;  %v274_v55 = vadd.f32 %v1486_v10, %v251_v53  ;;  %v275_v58 = vadd.f32 %v1486_v10, %v252_v56  ;;  %v276_v59 = vadd.f32 %v1486_v10, %v253_v57  ;;  %v254_v60 = vld [vmem:[%s1472_s25 + $0x38] sm:$0xff]  ;;  %v255_v61 = vld [vmem:[%s1472_s25 + $0x40] sm:$0xff]  ;;  %v256_v0 = vld [vmem:[%s1472_s25 + $0x48] sm:$0xff] }
  0x77   : > { %1000 = vmatprep.subr.bf16.mxu1 %v999_v28  ;;  %v277_v62 = vadd.f32 %v1486_v10, %v254_v60  ;;  %v278_v63 = vadd.f32 %v1486_v10, %v255_v61  ;;  %v257_v1 = vld [vmem:[%s1472_s25 + $0x50] sm:$0xff]  ;;  %v279_v2 = vadd.f32 %v1486_v10, %v256_v0  ;;  %v258_v4 = vld [vmem:[%s1472_s25 + $0x58] sm:$0xff]  ;;  %v259_v5 = vld [vmem:[%s1472_s25 + $0x60] sm:$0xff] }
  0x78   : > { %v280_v3 = vadd.f32 %v1486_v10, %v257_v1  ;;  %v281_v6 = vadd.f32 %v1486_v10, %v258_v4  ;;  %v282_v7 = vadd.f32 %v1486_v10, %v259_v5  ;;  %v260_v8 = vld [vmem:[%s1472_s25 + $0x68] sm:$0xff]  ;;  %v261_v9 = vld [vmem:[%s1472_s25 + $0x70] sm:$0xff]  ;;  %v262_v13 = vld [vmem:[%s1472_s25 + $0x78] sm:$0xff] }
  0x79   : > { %974 = vmatpush3.bf16.msra.mxu0 %v971_v14  ;;  %v283_v11 = vadd.f32 %v1486_v10, %v260_v8  ;;  %v284_v12 = vadd.f32 %v1486_v10, %v261_v9  ;;  %v285_v14 = vadd.f32 %v1486_v10, %v262_v13  ;;  %v477_v15 = vld [vmem:[#allocation7 + $0x70] sm:$0xff]  ;;  %v478_v16 = vld [vmem:[#allocation7 + $0x78] sm:$0xff] }
  0x7a   : > { %976 = vmatprep.subr.bf16.mxu0 %v975_v22  ;;  %1002 = vmatpush3.bf16.msra.mxu1 %v999_v28  ;;  %v1019_v17 = vpack.c.bf16 %v478_v16, %v477_v15 }
  0x7b   : > { %1004 = vmatprep.subr.bf16.mxu1 %v1003_v34 }
  0x7d   : > { %978 = vmatpush3.bf16.msra.mxu0 %v975_v22 }
  0x7e   : > { %980 = vmatprep.subr.bf16.mxu0 %v979_v29  ;;  %1006 = vmatpush3.bf16.msra.mxu1 %v1003_v34 }
  0x7f   : > { %1008 = vmatprep.subr.bf16.mxu1 %v1007_v40 }
  0x81   : > { %982 = vmatpush3.bf16.msra.mxu0 %v979_v29 }
  0x82   : > { %984 = vmatprep.subr.bf16.mxu0 %v983_v35  ;;  %1010 = vmatpush3.bf16.msra.mxu1 %v1007_v40 }
  0x83   : > { %1012 = vmatprep.subr.bf16.mxu1 %v1011_v45 }
  0x85   : > { %986 = vmatpush3.bf16.msra.mxu0 %v983_v35 }
  0x86   : > { %988 = vmatprep.subr.bf16.mxu0 %v987_v41  ;;  %1014 = vmatpush3.bf16.msra.mxu1 %v1011_v45 }
  0x87   : > { %1016 = vmatprep.subr.bf16.mxu1 %v1015_v52 }
  0x89   : > { %990 = vmatpush3.bf16.msra.mxu0 %v987_v41 }
  0x8a   : > { %1018 = vmatpush3.bf16.msra.mxu1 %v1015_v52 }
  0x8b   : > { %1020 = vmatprep.subr.bf16.mxu1 %v1019_v17 }
  0x8c   : > { %880 = vmatmul.mubr.f32.vlgmr.msra.gmra.mrb[0].mxu0 %v271_v49 }
  0x8d   : > { %882 = vmatprep.mubr.f32.mxu0 %v272_v50 }
  0x8e   : > { %1022 = vmatpush3.bf16.msra.mxu1 %v1019_v17 }
  0x90   : > { %883 = vmatmul.mubr.f32.gmra.mrb[2].mxu0 %v273_v54 }
  0x91   : > { %885 = vmatprep.mubr.f32.mxu0 %v274_v55 }
  0x94   : > { %886 = vmatmul.mubr.f32.gmra.mrb[4].mxu0 %v275_v58 }
  0x95   : > { %888 = vmatprep.mubr.f32.mxu0 %v276_v59 }
  0x98   : > { %889 = vmatmul.mubr.f32.gmra.mrb[6].mxu0 %v277_v62 }
  0x99   : > { %891 = vmatprep.mubr.f32.mxu0 %v278_v63 }
  0x9c   : > { %892 = vmatmul.mubr.f32.gmra.mrb[8].mxu0 %v279_v2 }
  0x9d   : > { %894 = vmatprep.mubr.f32.mxu0 %v280_v3 }
  0xa0   : > { %895 = vmatmul.mubr.f32.gmra.mrb[10].mxu0 %v281_v6 }
  0xa1   : > { %897 = vmatprep.mubr.f32.mxu0 %v282_v7 }
  0xa4   : > { %898 = vmatmul.mubr.f32.gmra.mrb[12].mxu0 %v283_v11 }
  0xa5   : > { %900 = vmatprep.mubr.f32.mxu0 %v284_v12 }
  0xa8   : > { %901 = vmatmul.mubr.f32.gmra.mrb[14].mxu0 %v285_v14 }
 0x15f   : > { %v881_v18 = vpop.f32.mrb[0].mxu0 }
 0x160   : > { %v368_v19 = vpop.f32.mrb[1].mxu0  ;;  %v448_v21 = vmax.f32 %v881_v18, 0.0 }
 0x161   : > { %v447_v20 = vmax.f32 %v368_v19, 0.0 }
 0x163   : > { %v884_v22 = vpop.f32.mrb[2].mxu0  ;;  %935 = vmatprep.mubr.f32.mxu1 %v447_v20 }
 0x164   : > { %v378_v23 = vpop.f32.mrb[3].mxu0  ;;  %936 = vmatmul.mubr.f32.vlgmr.msra.gmra.mrb[0].mxu1 %v448_v21  ;;  %v450_v25 = vmax.f32 %v884_v22, 0.0 }
 0x165   : > { %v449_v24 = vmax.f32 %v378_v23, 0.0 }
 0x167   : > { %v887_v26 = vpop.f32.mrb[4].mxu0  ;;  %938 = vmatprep.mubr.f32.mxu1 %v449_v24 }
 0x168   : > { %v388_v27 = vpop.f32.mrb[5].mxu0  ;;  %939 = vmatmul.mubr.f32.gmra.mrb[2].mxu1 %v450_v25  ;;  %v452_v29 = vmax.f32 %v887_v26, 0.0 }
 0x169   : > { %v451_v28 = vmax.f32 %v388_v27, 0.0 }
 0x16b   : > { %v890_v30 = vpop.f32.mrb[6].mxu0  ;;  %941 = vmatprep.mubr.f32.mxu1 %v451_v28 }
 0x16c   : > { %v398_v31 = vpop.f32.mrb[7].mxu0  ;;  %942 = vmatmul.mubr.f32.gmra.mrb[4].mxu1 %v452_v29  ;;  %v454_v33 = vmax.f32 %v890_v30, 0.0 }
 0x16d   : > { %v453_v32 = vmax.f32 %v398_v31, 0.0 }
 0x16f   : > { %v893_v34 = vpop.f32.mrb[8].mxu0  ;;  %944 = vmatprep.mubr.f32.mxu1 %v453_v32 }
 0x170   : > { %v408_v35 = vpop.f32.mrb[9].mxu0  ;;  %945 = vmatmul.mubr.f32.gmra.mrb[6].mxu1 %v454_v33  ;;  %v456_v37 = vmax.f32 %v893_v34, 0.0 }
 0x171   : > { %v455_v36 = vmax.f32 %v408_v35, 0.0 }
 0x173   : > { %v896_v38 = vpop.f32.mrb[10].mxu0  ;;  %947 = vmatprep.mubr.f32.mxu1 %v455_v36 }
 0x174   : > { %v418_v39 = vpop.f32.mrb[11].mxu0  ;;  %948 = vmatmul.mubr.f32.gmra.mrb[8].mxu1 %v456_v37  ;;  %v458_v41 = vmax.f32 %v896_v38, 0.0 }
 0x175   : > { %v457_v40 = vmax.f32 %v418_v39, 0.0 }
 0x177   : > { %v899_v42 = vpop.f32.mrb[12].mxu0  ;;  %950 = vmatprep.mubr.f32.mxu1 %v457_v40 }
 0x178   : > { %v428_v43 = vpop.f32.mrb[13].mxu0  ;;  %951 = vmatmul.mubr.f32.gmra.mrb[10].mxu1 %v458_v41  ;;  %v460_v45 = vmax.f32 %v899_v42, 0.0 }
 0x179   : > { %v459_v44 = vmax.f32 %v428_v43, 0.0 }
 0x17b   : > { %v902_v46 = vpop.f32.mrb[14].mxu0  ;;  %953 = vmatprep.mubr.f32.mxu1 %v459_v44 }
 0x17c   : > { %v438_v47 = vpop.f32.mrb[15].mxu0  ;;  %954 = vmatmul.mubr.f32.gmra.mrb[12].mxu1 %v460_v45  ;;  %v462_v49 = vmax.f32 %v902_v46, 0.0 }
 0x17d   : > { %v461_v48 = vmax.f32 %v438_v47, 0.0 }
 0x17f   : > { %956 = vmatprep.mubr.f32.mxu1 %v461_v48 }
 0x180   : > { %957 = vmatmul.mubr.f32.gmra.mrb[14].mxu1 %v462_v49 }
 0x237   : > { %v937_v50 = vpop.f32.mrb[0].mxu1 }
 0x238   : > { %v625_v51 = vsub.f32 %v937_v50, %v1486_v10  ;;  %v545_v52 = vpop.f32.mrb[1].mxu1 }
 0x239   : > { %v624_v53 = vsub.f32 %v545_v52, %v1486_v10 }
 0x23a   : > { %641 = vst [vmem:[%s1523_s11 + $0x8] sm:$0xff] %v625_v51 }
 0x23b   : > { %640 = vst [vmem:[%s1523_s11] sm:$0xff] %v624_v53  ;;  %v940_v54 = vpop.f32.mrb[2].mxu1 }
 0x23c   : > { %v627_v55 = vsub.f32 %v940_v54, %v1486_v10  ;;  %v555_v56 = vpop.f32.mrb[3].mxu1 }
 0x23d   : > { %v626_v57 = vsub.f32 %v555_v56, %v1486_v10 }
 0x23e   : > { %643 = vst [vmem:[%s1523_s11 + $0x18] sm:$0xff] %v627_v55 }
 0x23f   : > { %642 = vst [vmem:[%s1523_s11 + $0x10] sm:$0xff] %v626_v57  ;;  %v943_v58 = vpop.f32.mrb[4].mxu1 }
 0x240   : > { %v629_v59 = vsub.f32 %v943_v58, %v1486_v10  ;;  %v565_v60 = vpop.f32.mrb[5].mxu1 }
 0x241   : > { %v628_v61 = vsub.f32 %v565_v60, %v1486_v10 }
 0x242   : > { %645 = vst [vmem:[%s1523_s11 + $0x28] sm:$0xff] %v629_v59 }
 0x243   : > { %644 = vst [vmem:[%s1523_s11 + $0x20] sm:$0xff] %v628_v61  ;;  %v946_v62 = vpop.f32.mrb[6].mxu1 }
 0x244   : > { %v631_v63 = vsub.f32 %v946_v62, %v1486_v10  ;;  %v575_v0 = vpop.f32.mrb[7].mxu1 }
 0x245   : > { %v630_v1 = vsub.f32 %v575_v0, %v1486_v10 }
 0x246   : > { %647 = vst [vmem:[%s1523_s11 + $0x38] sm:$0xff] %v631_v63 }
 0x247   : > { %646 = vst [vmem:[%s1523_s11 + $0x30] sm:$0xff] %v630_v1  ;;  %v949_v2 = vpop.f32.mrb[8].mxu1 }
 0x248   : > { %v633_v3 = vsub.f32 %v949_v2, %v1486_v10  ;;  %v585_v4 = vpop.f32.mrb[9].mxu1 }
 0x249   : > { %v632_v5 = vsub.f32 %v585_v4, %v1486_v10 }
 0x24a   : > { %649 = vst [vmem:[%s1523_s11 + $0x48] sm:$0xff] %v633_v3 }
 0x24b   : > { %648 = vst [vmem:[%s1523_s11 + $0x40] sm:$0xff] %v632_v5  ;;  %v952_v6 = vpop.f32.mrb[10].mxu1 }
 0x24c   : > { %v635_v7 = vsub.f32 %v952_v6, %v1486_v10  ;;  %v595_v8 = vpop.f32.mrb[11].mxu1 }
 0x24d   : > { %v634_v9 = vsub.f32 %v595_v8, %v1486_v10 }
 0x24e   : > { %651 = vst [vmem:[%s1523_s11 + $0x58] sm:$0xff] %v635_v7 }
 0x24f   : > { %650 = vst [vmem:[%s1523_s11 + $0x50] sm:$0xff] %v634_v9  ;;  %v955_v11 = vpop.f32.mrb[12].mxu1 }
 0x250   : > { %v637_v12 = vsub.f32 %v955_v11, %v1486_v10  ;;  %v605_v13 = vpop.f32.mrb[13].mxu1 }
 0x251   : > { %v636_v14 = vsub.f32 %v605_v13, %v1486_v10 }
 0x252   : > { %653 = vst [vmem:[%s1523_s11 + $0x68] sm:$0xff] %v637_v12 }
 0x253   : > { %652 = vst [vmem:[%s1523_s11 + $0x60] sm:$0xff] %v636_v14  ;;  %v958_v15 = vpop.f32.mrb[14].mxu1 }
 0x254   : > { %v639_v16 = vsub.f32 %v958_v15, %v1486_v10  ;;  %v615_v17 = vpop.f32.mrb[15].mxu1 }
 0x255   : > { %v638_v18 = vsub.f32 %v615_v17, %v1486_v10 }
 0x256   : > { %655 = vst [vmem:[%s1523_s11 + $0x78] sm:$0xff] %v639_v16 }
 0x257   : > { %654 = vst [vmem:[%s1523_s11 + $0x70] sm:$0xff] %v638_v18 }
 0x258   : > { %1193 = shalt.err (!%p1190_p1)
}
 0x259   : > { %s1194_s9 = scalar_lea.hbm %s1557_s28, 2048  ;;  %s1198_s25 = scalar_lea.hbm %s1610_s4, 4096 }
 0x25a   : > { %p1195_p13 = scmp.ne.s32.totalorder %s1557_s28, %s1194_s9  ;;  %p1199_p4 = scmp.lt.u32.totalorder %s1557_s28, %s1610_s4 }
 0x25b   : > { %p1200_p5 = scmp.lt.u32.totalorder %s1198_s25, %s1194_s9  ;;  %p1202_p11 = scmp.lt.u32.totalorder %s1194_s9, %s1557_s28 }
 0x25c   : > { %p1196_p6 = pnand %p1195_p13, %p1624_p0 }
 0x25d   : > { %p1201_p8 = por %p1200_p5, %p1199_p4 }
 0x25e   : > { %p1197_p10 = pneg %p1196_p6 }
 0x25f   : > { %p1203_p2 = por %p1202_p11, %p1201_p8 }
 0x261   : > { %p1204_p3 = pnand %p1203_p2, %p1197_p10 }
 0x263   : > { %1207 = shalt.err (!%p1204_p3)
}
 0x264   : > { %s1258_s11 = smov 128   ;;  %s1259_s12 = smov 8  }
 0x265   : > { %1033 = dma.vmem_to_hbm [thread:$0]  (%p1624_p0), %s1559_s30, 2048, %s1557_s28, %s657_s19, %s1258_s11, %s1258_s11, %s1259_s12  }
 0x266 PF: > { %s685_s6 = sand.u32 1, %s1238_s15   ;;  %p1625_p7 = scmp.ne.s32.totalorder %s1615_s22, 0 }
 0x267   : > { %p1626_p9 = scmp.ge.s32.totalorder %s1250_s18, 2  ;;  %s686_s7 = scalar_lea.sflag [#allocation4], %s685_s6 }
 0x269   : > { %p1047_p12 = pnand %p1626_p9, %p1625_p7 }
 0x26b   : > { %1233 = dma.done.wait (!%p1047_p12), %s686_s7, 2048  }
 0x26c   : > { %1235 = vsyncadd (!%p1047_p12), %s686_s7, 4294965248  ;;  %p18_p1 = scmp.ge.s32.totalorder %s1401_s26, 4   ;;  %s1627_s15 = smov %s1242_s16 }
 0x26d   : > { %s1628_s16 = smov %s1246_s17  ;;  %s1629_s17 = smov %s1417_s14 }
 0x26e   : > { %s1630_s18 = smov %s1401_s26  ;;  %20 = sbr.rel (!%p18_p1) target bundleno = 6 (0x6), region = 89 }
 0x275   :  { %691 = vsyncpa [#allocation3], 1 }
 0x276   :  { %693 = vsyncpa [#allocation3 + $0x1], 1 }
 0x277   :  { %694 = vsyncpa [#allocation6], 1 }
 0x278   :  { %695 = vsyncpa [#allocation4], 1 }
 0x279   :  { %697 = vsyncpa [#allocation4 + $0x1], 1 }

</bundles_post_ra>
